<compile_context>
chip_gen: v5e
topology: v5e:2x2
jax: 0.10.0
libtpu: 0.0.40
codegen_flags: <defaults>
</compile_context>

<pallas_src>
import functools

import numpy as np
import jax
import jax.numpy as jnp
from jax import lax
from jax.experimental import pallas as pl
from jax.experimental.pallas import tpu as pltpu

# ----------------------------- configuration --------------------------------
WAY = 3          # args.way
NUM_CLASSES = 4  # args.num_classes  (channels of the encoder embedding)
BN_EPS = 1e-5


# ------------------------------ Pallas kernel --------------------------------
def _base_learner_kernel(x_ref, w_ref, b_ref, scale_ref, shift_ref, mask_ref,
                         out_ref, *, H, W):
    """Per-batch-element: BN(affine) -> ReLU -> 3x3 conv (pad=1) as 9 MXU dots.

    x_ref     : VMEM f32 [1, C, H*W]   (one batch element, spatial flattened)
    w_ref     : VMEM f32 [9, way, C]   (tap-major conv weight: [dy*3+dx, o, c])
    b_ref     : VMEM f32 [way, 1]
    scale_ref : VMEM f32 [C, 1]        (1/sqrt(var+eps))
    shift_ref : VMEM f32 [C, 1]        (-mean/sqrt(var+eps))
    mask_ref  : VMEM f32 [9, H*W]      (0/1 boundary masks per tap)
    out_ref   : VMEM f32 [1, way, H*W]
    """
    HW = H * W
    way = out_ref.shape[1]

    x = x_ref[0]                                              # (C, HW)
    # BatchNorm (per-channel affine, stats precomputed outside) + ReLU.
    act = jnp.maximum(x * scale_ref[...] + shift_ref[...], 0.0)

    masks = mask_ref[...]                                     # (9, HW)
    acc = jnp.zeros((way, HW), jnp.float32)
    for k in range(9):                                        # unrolled taps
        dy, dx = divmod(k, 3)
        off = (dy - 1) * W + (dx - 1)                         # flattened shift
        if off == 0:
            tap = act                                         # center tap
        else:
            # tap[c, h*W+w] = act[c, h+dy-1, w+dx-1] (lane roll, XLU slot) ...
            tap = pltpu.roll(act, shift=(-off) % HW, axis=1)
            # ... zeroed where the 3x3 window falls outside the image (pad=1).
            tap = tap * masks[k:k + 1, :]
        acc = acc + jnp.dot(w_ref[k], tap,
                            precision=lax.Precision.HIGHEST,
                            preferred_element_type=jnp.float32)
    out_ref[...] = (acc + b_ref[...])[None]                   # (1, way, HW)


@jax.jit
def base_learner_forward(x, wt, bias):
    """Pallas-backed BaseLearner.forward.

    x    : f32 [M, num_classes, H, W]   (encoder embedding, NCHW)
    wt   : f32 [way, num_classes, 3, 3]
    bias : f32 [way]
    returns f32 [M, way, H, W]
    """
    x = x.astype(jnp.float32)
    N, C, H, W = x.shape
    way = wt.shape[0]
    HW = H * W

    # --- BatchNorm2d training-mode batch statistics (gamma=1, beta=0), folded
    #     into a per-channel affine and computed in plain XLA (tiny [C] arrays)
    #     so the kernel can be tiled over the batch.
    mean = jnp.mean(x, axis=(0, 2, 3))
    var = jnp.mean(jnp.square(x - mean[None, :, None, None]), axis=(0, 2, 3))
    scale = lax.rsqrt(var + BN_EPS).reshape(C, 1)
    shift = (-mean * lax.rsqrt(var + BN_EPS)).reshape(C, 1)

    # --- Tap-major conv weight: w_taps[dy*3+dx, o, c] = wt[o, c, dy, dx].
    w_taps = jnp.transpose(wt.astype(jnp.float32), (2, 3, 0, 1)).reshape(9, way, C)
    bias2 = bias.astype(jnp.float32).reshape(way, 1)

    # --- Static 0/1 boundary masks for the 9 taps (zero padding of 1).
    hh = np.arange(H)[:, None]
    ww = np.arange(W)[None, :]
    masks_np = np.stack([
        (((hh + dy - 1) >= 0) & ((hh + dy - 1) < H) &
         ((ww + dx - 1) >= 0) & ((ww + dx - 1) < W)).reshape(-1)
        for dy in range(3) for dx in range(3)
    ], axis=0).astype(np.float32)                             # (9, H*W)
    masks = jnp.asarray(masks_np)

    x_flat = x.reshape(N, C, HW)                              # lane-dense input

    kernel = functools.partial(_base_learner_kernel, H=H, W=W)
    out = pl.pallas_call(
        kernel,
        out_shape=jax.ShapeDtypeStruct((N, way, HW), jnp.float32),
        grid=(N,),
        in_specs=[
            pl.BlockSpec((1, C, HW), lambda n: (n, 0, 0)),    # per-batch block
            pl.BlockSpec((9, way, C), lambda n: (0, 0, 0)),   # weights (resident)
            pl.BlockSpec((way, 1), lambda n: (0, 0)),         # bias
            pl.BlockSpec((C, 1), lambda n: (0, 0)),           # BN scale
            pl.BlockSpec((C, 1), lambda n: (0, 0)),           # BN shift
            pl.BlockSpec((9, HW), lambda n: (0, 0)),          # boundary masks
        ],
        out_specs=pl.BlockSpec((1, way, HW), lambda n: (n, 0, 0)),
        compiler_params=pltpu.CompilerParams(
            dimension_semantics=("parallel",)),
    )(x_flat, w_taps, bias2, scale, shift, masks)
    return out.reshape(N, way, H, W)


# ------------------------------ MtlLearner wrapper ---------------------------
class MtlLearner:
    """Thin JAX wrapper mirroring models/mtl.py::MtlLearner.

    Only the BaseLearner compute path is materialized as a Pallas kernel
    (see module-level TODOs for the encoder / losses / inner loop).
    """

    def __init__(self, way=WAY, num_classes=NUM_CLASSES, mode="meta", key=None):
        self.mode = mode
        key = jax.random.PRNGKey(0) if key is None else key
        k_w, k_b = jax.random.split(key)
        # nn init is ones/zeros; use deterministic random values for a
        # non-degenerate numerical check (same shapes as the module).
        self.wt = 0.1 * jax.random.normal(k_w, (way, num_classes, 3, 3), jnp.float32)
        self.bias = 0.1 * jax.random.normal(k_b, (way,), jnp.float32)

    def base_learner(self, embedding, the_vars=None):
        wt, bias = (self.wt, self.bias) if the_vars is None else the_vars
        return base_learner_forward(embedding, wt, bias)

    def forward(self, embedding_query):
        # meta/val path, applied to encoder embeddings (encoder is a TODO above).
        return self.base_learner(embedding_query)


# ------------------------------ reference (plain JAX) ------------------------
def _reference(x, wt, bias):
    x = x.astype(jnp.float32)
    mean = x.mean(axis=(0, 2, 3), keepdims=True)
    var = ((x - mean) ** 2).mean(axis=(0, 2, 3), keepdims=True)
    act = jnp.maximum((x - mean) / jnp.sqrt(var + BN_EPS), 0.0)
    out = lax.conv_general_dilated(
        act, wt.astype(jnp.float32),
        window_strides=(1, 1), padding=((1, 1), (1, 1)),
        dimension_numbers=("NCHW", "OIHW", "NCHW"),
        precision=lax.Precision.HIGHEST)
    return out + bias[None, :, None, None]


# ----------------------------------- main ------------------------------------
if __name__ == "__main__":
    key = jax.random.PRNGKey(0)
    k_x, k_w = jax.random.split(key)

    M, H, W = 2, 16, 16
    # "embedding" input to BaseLearner: [M, num_classes, H, W], NCHW layout.
    x = jax.random.normal(k_x, (M, NUM_CLASSES, H, W), jnp.float32)

    model = MtlLearner(way=WAY, num_classes=NUM_CLASSES, mode="meta", key=k_w)

    out = model.forward(x)
    out = jax.block_until_ready(out)

    ref = _reference(x, model.wt, model.bias)
    assert out.shape == (M, WAY, H, W), out.shape
    err = float(jnp.abs(out - ref).max())
    assert jnp.allclose(out, ref, atol=2e-3, rtol=2e-3), err

    print("KERNEL_OK")
</pallas_src>

<mosaic_0001>
module attributes {stable_mosaic.version = 11 : i64} {
  func.func @_base_learner_kernel(%arg0: i32, %arg1: memref<1x4x256xf32, #tpu.memory_space<vmem>>, %arg2: memref<9x3x4xf32, #tpu.memory_space<vmem>>, %arg3: memref<3x1xf32, #tpu.memory_space<vmem>>, %arg4: memref<4x1xf32, #tpu.memory_space<vmem>>, %arg5: memref<4x1xf32, #tpu.memory_space<vmem>>, %arg6: memref<9x256xf32, #tpu.memory_space<vmem>>, %arg7: memref<1x3x256xf32, #tpu.memory_space<vmem>>) attributes {dimension_semantics = [#tpu.dimension_semantics<parallel>], iteration_bounds = array<i64: 2>, scalar_prefetch = 0 : i64, scratch_operands = 0 : i64, tpu.core_type = #tpu.core_type<tc>, window_params = [{transform_indices = @transform_0, window_bounds = array<i64: 1, 4, 256>}, {pipeline_mode = #tpu.pipeline_mode<synchronous>, transform_indices = @transform_1, window_bounds = array<i64: 9, 3, 4>}, {pipeline_mode = #tpu.pipeline_mode<synchronous>, transform_indices = @transform_2, window_bounds = array<i64: 3, 1>}, {pipeline_mode = #tpu.pipeline_mode<synchronous>, transform_indices = @transform_3, window_bounds = array<i64: 4, 1>}, {pipeline_mode = #tpu.pipeline_mode<synchronous>, transform_indices = @transform_4, window_bounds = array<i64: 4, 1>}, {pipeline_mode = #tpu.pipeline_mode<synchronous>, transform_indices = @transform_5, window_bounds = array<i64: 9, 256>}, {transform_indices = @transform_6, window_bounds = array<i64: 1, 3, 256>}]} {
    %c0 = arith.constant 0 : index
    %c0_0 = arith.constant 0 : index
    %c0_1 = arith.constant 0 : index
    %0 = vector.load %arg1[%c0, %c0_0, %c0_1] : memref<1x4x256xf32, #tpu.memory_space<vmem>>, vector<1x4x256xf32>
    %1 = vector.shape_cast %0 : vector<1x4x256xf32> to vector<4x256xf32>
    %c0_2 = arith.constant 0 : index
    %c0_3 = arith.constant 0 : index
    %2 = vector.load %arg4[%c0_2, %c0_3] : memref<4x1xf32, #tpu.memory_space<vmem>>, vector<4x1xf32>
    %3 = vector.broadcast %2 : vector<4x1xf32> to vector<4x256xf32>
    %4 = arith.mulf %1, %3 : vector<4x256xf32>
    %c0_4 = arith.constant 0 : index
    %c0_5 = arith.constant 0 : index
    %5 = vector.load %arg5[%c0_4, %c0_5] : memref<4x1xf32, #tpu.memory_space<vmem>>, vector<4x1xf32>
    %6 = vector.broadcast %5 : vector<4x1xf32> to vector<4x256xf32>
    %7 = arith.addf %4, %6 : vector<4x256xf32>
    %cst = arith.constant 0.000000e+00 : f32
    %8 = vector.broadcast %cst : f32 to vector<4x256xf32>
    %9 = arith.maximumf %7, %8 : vector<4x256xf32>
    %c0_6 = arith.constant 0 : index
    %c0_7 = arith.constant 0 : index
    %10 = vector.load %arg6[%c0_6, %c0_7] : memref<9x256xf32, #tpu.memory_space<vmem>>, vector<9x256xf32>
    %cst_8 = arith.constant 0.000000e+00 : f32
    %11 = vector.broadcast %cst_8 : f32 to vector<3x256xf32>
    %c17_i32 = arith.constant 17 : i32
    %12 = tpu.dynamic_rotate %9 by %c17_i32 dim 1 : vector<4x256xf32>, i32 -> vector<4x256xf32>
    %13 = vector.extract_strided_slice %10 {offsets = [0, 0], sizes = [1, 256], strides = [1, 1]} : vector<9x256xf32> to vector<1x256xf32>
    %14 = vector.broadcast %13 : vector<1x256xf32> to vector<4x256xf32>
    %15 = arith.mulf %12, %14 : vector<4x256xf32>
    %c0_9 = arith.constant 0 : index
    %c0_10 = arith.constant 0 : index
    %c0_11 = arith.constant 0 : index
    %16 = vector.load %arg2[%c0_9, %c0_10, %c0_11] : memref<9x3x4xf32, #tpu.memory_space<vmem>>, vector<1x3x4xf32>
    %17 = vector.shape_cast %16 : vector<1x3x4xf32> to vector<3x4xf32>
    %cst_12 = arith.constant dense<0.000000e+00> : vector<3x256xf32>
    %18 = tpu.matmul %17, %15, %cst_12 {dimension_numbers = #tpu.dot_dimension_numbers<[1], [0], [0], [1], [0, 0, 1, 1], [], []>, precision = #tpu.contract_precision<fp32>} : vector<3x4xf32>, vector<4x256xf32>, vector<3x256xf32> -> vector<3x256xf32>
    %19 = arith.addf %11, %18 : vector<3x256xf32>
    %c16_i32 = arith.constant 16 : i32
    %20 = tpu.dynamic_rotate %9 by %c16_i32 dim 1 : vector<4x256xf32>, i32 -> vector<4x256xf32>
    %21 = vector.extract_strided_slice %10 {offsets = [1, 0], sizes = [1, 256], strides = [1, 1]} : vector<9x256xf32> to vector<1x256xf32>
    %22 = vector.broadcast %21 : vector<1x256xf32> to vector<4x256xf32>
    %23 = arith.mulf %20, %22 : vector<4x256xf32>
    %c1 = arith.constant 1 : index
    %c0_13 = arith.constant 0 : index
    %c0_14 = arith.constant 0 : index
    %24 = vector.load %arg2[%c1, %c0_13, %c0_14] : memref<9x3x4xf32, #tpu.memory_space<vmem>>, vector<1x3x4xf32>
    %25 = vector.shape_cast %24 : vector<1x3x4xf32> to vector<3x4xf32>
    %cst_15 = arith.constant dense<0.000000e+00> : vector<3x256xf32>
    %26 = tpu.matmul %25, %23, %cst_15 {dimension_numbers = #tpu.dot_dimension_numbers<[1], [0], [0], [1], [0, 0, 1, 1], [], []>, precision = #tpu.contract_precision<fp32>} : vector<3x4xf32>, vector<4x256xf32>, vector<3x256xf32> -> vector<3x256xf32>
    %27 = arith.addf %19, %26 : vector<3x256xf32>
    %c15_i32 = arith.constant 15 : i32
    %28 = tpu.dynamic_rotate %9 by %c15_i32 dim 1 : vector<4x256xf32>, i32 -> vector<4x256xf32>
    %29 = vector.extract_strided_slice %10 {offsets = [2, 0], sizes = [1, 256], strides = [1, 1]} : vector<9x256xf32> to vector<1x256xf32>
    %30 = vector.broadcast %29 : vector<1x256xf32> to vector<4x256xf32>
    %31 = arith.mulf %28, %30 : vector<4x256xf32>
    %c2 = arith.constant 2 : index
    %c0_16 = arith.constant 0 : index
    %c0_17 = arith.constant 0 : index
    %32 = vector.load %arg2[%c2, %c0_16, %c0_17] : memref<9x3x4xf32, #tpu.memory_space<vmem>>, vector<1x3x4xf32>
    %33 = vector.shape_cast %32 : vector<1x3x4xf32> to vector<3x4xf32>
    %cst_18 = arith.constant dense<0.000000e+00> : vector<3x256xf32>
    %34 = tpu.matmul %33, %31, %cst_18 {dimension_numbers = #tpu.dot_dimension_numbers<[1], [0], [0], [1], [0, 0, 1, 1], [], []>, precision = #tpu.contract_precision<fp32>} : vector<3x4xf32>, vector<4x256xf32>, vector<3x256xf32> -> vector<3x256xf32>
    %35 = arith.addf %27, %34 : vector<3x256xf32>
    %c1_i32 = arith.constant 1 : i32
    %36 = tpu.dynamic_rotate %9 by %c1_i32 dim 1 : vector<4x256xf32>, i32 -> vector<4x256xf32>
    %37 = vector.extract_strided_slice %10 {offsets = [3, 0], sizes = [1, 256], strides = [1, 1]} : vector<9x256xf32> to vector<1x256xf32>
    %38 = vector.broadcast %37 : vector<1x256xf32> to vector<4x256xf32>
    %39 = arith.mulf %36, %38 : vector<4x256xf32>
    %c3 = arith.constant 3 : index
    %c0_19 = arith.constant 0 : index
    %c0_20 = arith.constant 0 : index
    %40 = vector.load %arg2[%c3, %c0_19, %c0_20] : memref<9x3x4xf32, #tpu.memory_space<vmem>>, vector<1x3x4xf32>
    %41 = vector.shape_cast %40 : vector<1x3x4xf32> to vector<3x4xf32>
    %cst_21 = arith.constant dense<0.000000e+00> : vector<3x256xf32>
    %42 = tpu.matmul %41, %39, %cst_21 {dimension_numbers = #tpu.dot_dimension_numbers<[1], [0], [0], [1], [0, 0, 1, 1], [], []>, precision = #tpu.contract_precision<fp32>} : vector<3x4xf32>, vector<4x256xf32>, vector<3x256xf32> -> vector<3x256xf32>
    %43 = arith.addf %35, %42 : vector<3x256xf32>
    %c4 = arith.constant 4 : index
    %c0_22 = arith.constant 0 : index
    %c0_23 = arith.constant 0 : index
    %44 = vector.load %arg2[%c4, %c0_22, %c0_23] : memref<9x3x4xf32, #tpu.memory_space<vmem>>, vector<1x3x4xf32>
    %45 = vector.shape_cast %44 : vector<1x3x4xf32> to vector<3x4xf32>
    %cst_24 = arith.constant dense<0.000000e+00> : vector<3x256xf32>
    %46 = tpu.matmul %45, %9, %cst_24 {dimension_numbers = #tpu.dot_dimension_numbers<[1], [0], [0], [1], [0, 0, 1, 1], [], []>, precision = #tpu.contract_precision<fp32>} : vector<3x4xf32>, vector<4x256xf32>, vector<3x256xf32> -> vector<3x256xf32>
    %47 = arith.addf %43, %46 : vector<3x256xf32>
    %c255_i32 = arith.constant 255 : i32
    %48 = tpu.dynamic_rotate %9 by %c255_i32 dim 1 : vector<4x256xf32>, i32 -> vector<4x256xf32>
    %49 = vector.extract_strided_slice %10 {offsets = [5, 0], sizes = [1, 256], strides = [1, 1]} : vector<9x256xf32> to vector<1x256xf32>
    %50 = vector.broadcast %49 : vector<1x256xf32> to vector<4x256xf32>
    %51 = arith.mulf %48, %50 : vector<4x256xf32>
    %c5 = arith.constant 5 : index
    %c0_25 = arith.constant 0 : index
    %c0_26 = arith.constant 0 : index
    %52 = vector.load %arg2[%c5, %c0_25, %c0_26] : memref<9x3x4xf32, #tpu.memory_space<vmem>>, vector<1x3x4xf32>
    %53 = vector.shape_cast %52 : vector<1x3x4xf32> to vector<3x4xf32>
    %cst_27 = arith.constant dense<0.000000e+00> : vector<3x256xf32>
    %54 = tpu.matmul %53, %51, %cst_27 {dimension_numbers = #tpu.dot_dimension_numbers<[1], [0], [0], [1], [0, 0, 1, 1], [], []>, precision = #tpu.contract_precision<fp32>} : vector<3x4xf32>, vector<4x256xf32>, vector<3x256xf32> -> vector<3x256xf32>
    %55 = arith.addf %47, %54 : vector<3x256xf32>
    %c241_i32 = arith.constant 241 : i32
    %56 = tpu.dynamic_rotate %9 by %c241_i32 dim 1 : vector<4x256xf32>, i32 -> vector<4x256xf32>
    %57 = vector.extract_strided_slice %10 {offsets = [6, 0], sizes = [1, 256], strides = [1, 1]} : vector<9x256xf32> to vector<1x256xf32>
    %58 = vector.broadcast %57 : vector<1x256xf32> to vector<4x256xf32>
    %59 = arith.mulf %56, %58 : vector<4x256xf32>
    %c6 = arith.constant 6 : index
    %c0_28 = arith.constant 0 : index
    %c0_29 = arith.constant 0 : index
    %60 = vector.load %arg2[%c6, %c0_28, %c0_29] : memref<9x3x4xf32, #tpu.memory_space<vmem>>, vector<1x3x4xf32>
    %61 = vector.shape_cast %60 : vector<1x3x4xf32> to vector<3x4xf32>
    %cst_30 = arith.constant dense<0.000000e+00> : vector<3x256xf32>
    %62 = tpu.matmul %61, %59, %cst_30 {dimension_numbers = #tpu.dot_dimension_numbers<[1], [0], [0], [1], [0, 0, 1, 1], [], []>, precision = #tpu.contract_precision<fp32>} : vector<3x4xf32>, vector<4x256xf32>, vector<3x256xf32> -> vector<3x256xf32>
    %63 = arith.addf %55, %62 : vector<3x256xf32>
    %c240_i32 = arith.constant 240 : i32
    %64 = tpu.dynamic_rotate %9 by %c240_i32 dim 1 : vector<4x256xf32>, i32 -> vector<4x256xf32>
    %65 = vector.extract_strided_slice %10 {offsets = [7, 0], sizes = [1, 256], strides = [1, 1]} : vector<9x256xf32> to vector<1x256xf32>
    %66 = vector.broadcast %65 : vector<1x256xf32> to vector<4x256xf32>
    %67 = arith.mulf %64, %66 : vector<4x256xf32>
    %c7 = arith.constant 7 : index
    %c0_31 = arith.constant 0 : index
    %c0_32 = arith.constant 0 : index
    %68 = vector.load %arg2[%c7, %c0_31, %c0_32] : memref<9x3x4xf32, #tpu.memory_space<vmem>>, vector<1x3x4xf32>
    %69 = vector.shape_cast %68 : vector<1x3x4xf32> to vector<3x4xf32>
    %cst_33 = arith.constant dense<0.000000e+00> : vector<3x256xf32>
    %70 = tpu.matmul %69, %67, %cst_33 {dimension_numbers = #tpu.dot_dimension_numbers<[1], [0], [0], [1], [0, 0, 1, 1], [], []>, precision = #tpu.contract_precision<fp32>} : vector<3x4xf32>, vector<4x256xf32>, vector<3x256xf32> -> vector<3x256xf32>
    %71 = arith.addf %63, %70 : vector<3x256xf32>
    %c239_i32 = arith.constant 239 : i32
    %72 = tpu.dynamic_rotate %9 by %c239_i32 dim 1 : vector<4x256xf32>, i32 -> vector<4x256xf32>
    %73 = vector.extract_strided_slice %10 {offsets = [8, 0], sizes = [1, 256], strides = [1, 1]} : vector<9x256xf32> to vector<1x256xf32>
    %74 = vector.broadcast %73 : vector<1x256xf32> to vector<4x256xf32>
    %75 = arith.mulf %72, %74 : vector<4x256xf32>
    %c8 = arith.constant 8 : index
    %c0_34 = arith.constant 0 : index
    %c0_35 = arith.constant 0 : index
    %76 = vector.load %arg2[%c8, %c0_34, %c0_35] : memref<9x3x4xf32, #tpu.memory_space<vmem>>, vector<1x3x4xf32>
    %77 = vector.shape_cast %76 : vector<1x3x4xf32> to vector<3x4xf32>
    %cst_36 = arith.constant dense<0.000000e+00> : vector<3x256xf32>
    %78 = tpu.matmul %77, %75, %cst_36 {dimension_numbers = #tpu.dot_dimension_numbers<[1], [0], [0], [1], [0, 0, 1, 1], [], []>, precision = #tpu.contract_precision<fp32>} : vector<3x4xf32>, vector<4x256xf32>, vector<3x256xf32> -> vector<3x256xf32>
    %79 = arith.addf %71, %78 : vector<3x256xf32>
    %c0_37 = arith.constant 0 : index
    %c0_38 = arith.constant 0 : index
    %80 = vector.load %arg3[%c0_37, %c0_38] : memref<3x1xf32, #tpu.memory_space<vmem>>, vector<3x1xf32>
    %81 = vector.broadcast %80 : vector<3x1xf32> to vector<3x256xf32>
    %82 = arith.addf %79, %81 : vector<3x256xf32>
    %83 = vector.shape_cast %82 : vector<3x256xf32> to vector<1x3x256xf32>
    %c0_39 = arith.constant 0 : index
    %c0_40 = arith.constant 0 : index
    %c0_41 = arith.constant 0 : index
    %84 = vector.load %arg7[%c0_39, %c0_40, %c0_41] : memref<1x3x256xf32, #tpu.memory_space<vmem>>, vector<1x3x256xf32>
    tpu.vector_store %arg7[%c0_39, %c0_40, %c0_41], %83 {strides = array<i32>} : memref<1x3x256xf32, #tpu.memory_space<vmem>>, vector<1x3x256xf32>,
    return
  }
  func.func @transform_0(%arg0: i32) -> (i32, i32, i32) {
    %c0_i32 = arith.constant 0 : i32
    %c0_i32_0 = arith.constant 0 : i32
    %c0_i32_1 = arith.constant 0 : i32
    return %arg0, %c0_i32, %c0_i32_0 : i32, i32, i32
  }
  func.func @transform_1(%arg0: i32) -> (i32, i32, i32) {
    %c0_i32 = arith.constant 0 : i32
    %c0_i32_0 = arith.constant 0 : i32
    %c0_i32_1 = arith.constant 0 : i32
    %c0_i32_2 = arith.constant 0 : i32
    return %c0_i32, %c0_i32_0, %c0_i32_1 : i32, i32, i32
  }
  func.func @transform_2(%arg0: i32) -> (i32, i32) {
    %c0_i32 = arith.constant 0 : i32
    %c0_i32_0 = arith.constant 0 : i32
    %c0_i32_1 = arith.constant 0 : i32
    return %c0_i32, %c0_i32_0 : i32, i32
  }
  func.func @transform_3(%arg0: i32) -> (i32, i32) {
    %c0_i32 = arith.constant 0 : i32
    %c0_i32_0 = arith.constant 0 : i32
    %c0_i32_1 = arith.constant 0 : i32
    return %c0_i32, %c0_i32_0 : i32, i32
  }
  func.func @transform_4(%arg0: i32) -> (i32, i32) {
    %c0_i32 = arith.constant 0 : i32
    %c0_i32_0 = arith.constant 0 : i32
    %c0_i32_1 = arith.constant 0 : i32
    return %c0_i32, %c0_i32_0 : i32, i32
  }
  func.func @transform_5(%arg0: i32) -> (i32, i32) {
    %c0_i32 = arith.constant 0 : i32
    %c0_i32_0 = arith.constant 0 : i32
    %c0_i32_1 = arith.constant 0 : i32
    return %c0_i32, %c0_i32_0 : i32, i32
  }
  func.func @transform_6(%arg0: i32) -> (i32, i32, i32) {
    %c0_i32 = arith.constant 0 : i32
    %c0_i32_0 = arith.constant 0 : i32
    %c0_i32_1 = arith.constant 0 : i32
    return %arg0, %c0_i32, %c0_i32_0 : i32, i32, i32
  }
}

</mosaic_0001>

<bundles_post_ra>
// kernel: mul.0
= control target key start
LH: loop header
LB: loop body
LE: loop exit
PB: predicated region body
PF: predicated region fallthrough
CT: control target
= control target key end

     0   :  { %s34_s0 = inlined_call_operand.vmem [shape: f32[4,1], index: 0, kind: input, shape index: {}]   ;;  %s35_s1 = inlined_call_operand.vmem [shape: f32[4,1], index: 1, kind: input, shape index: {}]   ;;  %s36_s2 = inlined_call_operand.vmem [shape: f32[4,1], index: 2, kind: output, shape index: {}]  }
   0x1   :  { %v3_v0 = vld [vmem:[%s34_s0] sm:$0xf] }
   0x2   :  { %v4_v1 = vld [vmem:[%s35_s1] sm:$0xf] }
   0x3   :  { %v7_v2 = vmul.f32 %v4_v1, %v3_v0 }
   0x5   :  { %9 = vst [vmem:[%s36_s2] sm:$0xf] %v7_v2 }

// kernel: base_learner_forward.1
= control target key start
LH: loop header
LB: loop body
LE: loop exit
PB: predicated region body
PF: predicated region fallthrough
CT: control target
= control target key end

     0   :  { %s3318_s21 = smov 0   ;;  %s3722_s0 = inlined_call_operand.vmem [shape: f32[2,4,256], index: 0, kind: input, shape index: {}]   ;;  %s3723_s1 = inlined_call_operand.vmem [shape: f32[9,3,4], index: 1, kind: input, shape index: {}]   ;;  %s3724_s2 = inlined_call_operand.vmem [shape: f32[3,1], index: 2, kind: input, shape index: {}]   ;;  %s3725_s3 = inlined_call_operand.vmem [shape: f32[4,1], index: 3, kind: input, shape index: {}]   ;;  %s3726_s4 = inlined_call_operand.vmem [shape: f32[4,1], index: 4, kind: input, shape index: {}]   ;;  %s3727_s5 = inlined_call_operand.vmem [shape: f32[9,256], index: 5, kind: input, shape index: {}]   ;;  %s3728_s6 = inlined_call_operand.vmem [shape: f32[2,3,256], index: 6, kind: output, shape index: {}]  }
   0x1 LB: > { %s3223_s22 = sadd.s32 4294967295, %s3271_s21   ;;  %p3227_p0 = scmp.ge.s32.totalorder %s3271_s21, 1  ;;  %s3271_s21 = sphi %s3318_s21, %s16_s21  }
   0x2   : > { %p212_p1 = scmp.lt.s32.totalorder %s3271_s21, 3 }
   0x4   : > { %p213_p2 = pnand %p3227_p0, %p212_p1 }
   0x5   : > { %p242_p3 = scmp.lt.s32.totalorder (!%p213_p2), %s3223_s22, 1  ;;  %s3275_s7 = smov (!%p213_p2), 17  }
   0x6   : > { %216 = sbr.rel (%p213_p2) target bundleno = 645 (0x285), region = 44  ;;  %s3276_s8 = smov (!%p213_p2), 16  }
   0x7   : > { %s3277_s9 = smov (!%p213_p2), 15   ;;  %s3278_s10 = smov (!%p213_p2), 1  }
   0x8   : > { %s3279_s11 = smov (!%p213_p2), 127   ;;  %s3280_s12 = smov (!%p213_p2), 113  }
   0x9   : > { %s3281_s13 = smov (!%p213_p2), 112   ;;  %s3282_s16 = smov (!%p213_p2), 111  }
   0xb   : > { %v253_v0 = vld [vmem:[%s3725_s3] sm:$0xf]  ;;  %v3273_v1 = vmov 0   ;;  %s3730_s22 = smov (!%p242_p3, %s3223_s22), 1  ;;  %v3274_v3 = vmov 839922192   ;;  %v290_v37 = vlaneseq }
   0xc   : > { %3262 = vset.pattern.permute.xlu0 %v3273_v1  ;;  %v264_v2 = vld [vmem:[%s3726_s4] sm:$0xf]  ;;  %v259_v4 = vunpack.c.l.s4 %v3274_v3  ;;  %s3242_s27 = sshll.u32 %s3730_s22, 3  ;;  %v3232_v33 = vld [vmem:[%s3723_s1 + $0x4] sm:$0x7]  ;;  %vm318_vm0 = vcmask 31744  }
   0xd   : > { %256 = vperm.xlu0 %3262, %v253_v0   ;;  %s246_s30 = scalar_lea.vmem %s3722_s0, %s3242_s27  ;;  %v3154_v30 = vld [vmem:[%s3724_s2] sm:$0x7]  ;;  %v320_v34 = vsel %vm318_vm0, %v3232_v33, 0  ;;  %v3356_v40 = vand.u32 127, %v290_v37  ;;  %v3366_v42 = vld [vmem:[%s3727_s5 + $0x8] sm:$0xff]  ;;  %vm322_vm3 = vcmask 1043456   ;;  %s251_s26 = scalar_lea.vmem %s3728_s6, %s3242_s27 }
   0xe   : > { %v260_v6 = vunpack.c.0.s8 %v259_v4  ;;  %v252_v8 = vld [vmem:[%s246_s30] sm:$0xff]  ;;  %v3351_v36 = vand.u32 4294901760, %v320_v34  ;;  %v313_v46 = vperm.slane %v3366_v42, 1  ;;  %v296_v48 = vperm.slane %v3366_v42, 0 }
   0xf   : > { %v3361_v41 = vld [vmem:[%s3727_s5] sm:$0xff]  ;;  %vm292_vm1 = vcmp.lt.s32.totalorder %v3356_v40, 17  ;;  %vm309_vm2 = vcmp.lt.s32.totalorder %v3356_v40, 16  ;;  %vm931_vm4 = vcmp.lt.s32.totalorder %v3356_v40, 15  ;;  %vm1252_vm5 = vcmp.lt.s32.totalorder %v3356_v40, 1 }
  0x10   : > { %v3354_v39 = vsub.f32 %v320_v34, %v3351_v36  ;;  %v312_v45 = vperm.slane %v3361_v41, 1  ;;  %v295_v47 = vperm.slane %v3361_v41, 0  ;;  %v299_v0 = vld [vmem:[%s3723_s1] sm:$0x7]  ;;  %vm1879_vm6 = vcmp.lt.s32.totalorder %v3356_v40, 127 }
  0x11   : > { %vm2200_vm7 = vcmp.lt.s32.totalorder %v3356_v40, 113  ;;  %vm2521_vm8 = vcmp.lt.s32.totalorder %v3356_v40, 112  ;;  %vm2842_vm9 = vcmp.lt.s32.totalorder %v3356_v40, 111 }
  0x12   : > { %v3369_v43 = vand.u32 4294901760, %v3354_v39 }
  0x14   : > { %v349_v52 = vsub.f32 %v3354_v39, %v3369_v43 }
  0x15   : > { %267 = vperm.xlu0 %3262, %v264_v2  }
  0x16   : > { %v350_v61 = vand.u32 4294901760, %v349_v52 }
  0x7f   : > { %v257_v5 = vpop.permute.xlu0 %256 }
  0x80   : > { %v261_v7 = vperm.slane %v257_v5, %v260_v6  ;;  %v622_v5 = vsel %vm318_vm0, %v299_v0, 0 }
  0x82   : > { %v263_v10 = vmul.f32 %v261_v7, %v252_v8 }
  0x87   : > { %v268_v9 = vpop.permute.xlu0 %267 }
  0x88   : > { %v272_v11 = vperm.slane %v268_v9, %v260_v6 }
  0x8a   : > { %v274_v12 = vadd.f32 %v272_v11, %v263_v10  ;;  %v3393_v10 = vand.u32 4294901760, %v622_v5 }
  0x8c   : > { %v275_v13 = vmax.f32 %v274_v12, 0.0 }
  0x8e   : > { %281 = vst [vmem:[#allocation1] ss:$2 sm:$0xff] %v275_v13 }
  0x95   : > { %v282_v14 = vld.sshfl [vmem:[#allocation1] sm:$0xff pattern:$0x75316420]  ;;  %v283_v15 = vld.sshfl [vmem:[#allocation1 + $0x8] sm:$0xff pattern:$0x75316420] }
  0x96   : > { %286 = vrot.lane.b32.xlu2 %v282_v14, %s3275_s7  ;;  %300 = vst [vmem:[#allocation1] ss:$2 sm:$0xff] %v275_v13 }
  0x9d   : > { %v301_v16 = vld.sshfl [vmem:[#allocation1] sm:$0xff pattern:$0x75316420]  ;;  %v302_v17 = vld.sshfl [vmem:[#allocation1 + $0x8] sm:$0xff pattern:$0x75316420] }
  0x9e   : > { %288 = vrot.lane.b32.xlu2 %v283_v15, %s3275_s7  ;;  %305 = vrot.lane.b32.xlu1 %v301_v16, %s3276_s8  ;;  %922 = vst [vmem:[#allocation1] ss:$2 sm:$0xff] %v275_v13 }
  0xa5   : > { %v923_v18 = vld.sshfl [vmem:[#allocation1] sm:$0xff pattern:$0x75316420]  ;;  %v924_v19 = vld.sshfl [vmem:[#allocation1 + $0x8] sm:$0xff pattern:$0x75316420] }
  0xa6   : > { %307 = vrot.lane.b32.xlu1 %v302_v17, %s3276_s8  ;;  %927 = vrot.lane.b32.xlu0 %v923_v18, %s3277_s9  ;;  %1243 = vst [vmem:[#allocation1] ss:$2 sm:$0xff] %v275_v13  ;;  %v3399_v17 = vsub.f32 %v622_v5, %v3393_v10 }
  0xad   : > { %v1245_v20 = vld.sshfl [vmem:[#allocation1 + $0x8] sm:$0xff pattern:$0x75316420]  ;;  %v1244_v21 = vld.sshfl [vmem:[#allocation1] sm:$0xff pattern:$0x75316420] }
  0xae   : > { %929 = vrot.lane.b32.xlu1 %v924_v19, %s3277_s9  ;;  %1250 = vrot.lane.b32.xlu0 %v1245_v20, %s3278_s10  ;;  %1566 = vst [vmem:[#allocation1] ss:$2 sm:$0xff] %v275_v13  ;;  %v3405_v20 = vand.u32 4294901760, %v3399_v17 }
  0xaf   : > { %1248 = vrot.lane.b32.xlu2 %v1244_v21, %s3278_s10 }
  0xb5   : > { %v3340_v22 = vld.sshfl [vmem:[#allocation1] sm:$0xff pattern:$0x75316420]  ;;  %v3342_v23 = vld.sshfl [vmem:[#allocation1 + $0x8] sm:$0xff pattern:$0x75316420] }
  0xb6   : > { %1870 = vst [vmem:[#allocation1] ss:$2 sm:$0xff] %v275_v13 }
  0xbd   : > { %v1872_v24 = vld.sshfl [vmem:[#allocation1 + $0x8] sm:$0xff pattern:$0x75316420]  ;;  %v1871_v25 = vld.sshfl [vmem:[#allocation1] sm:$0xff pattern:$0x75316420] }
  0xbe   : > { %1877 = vrot.lane.b32.xlu2 %v1872_v24, %s3279_s11  ;;  %1875 = vrot.lane.b32.xlu1 %v1871_v25, %s3279_s11  ;;  %2191 = vst [vmem:[#allocation1] ss:$2 sm:$0xff] %v275_v13 }
  0xc5   : > { %v2193_v26 = vld.sshfl [vmem:[#allocation1 + $0x8] sm:$0xff pattern:$0x75316420]  ;;  %v2192_v27 = vld.sshfl [vmem:[#allocation1] sm:$0xff pattern:$0x75316420] }
  0xc6   : > { %2198 = vrot.lane.b32.xlu1 %v2193_v26, %s3280_s12  ;;  %2196 = vrot.lane.b32.xlu0 %v2192_v27, %s3280_s12  ;;  %2512 = vst [vmem:[#allocation1] ss:$2 sm:$0xff] %v275_v13  ;;  %v934_v27 = vperm.slane %v3361_v41, 2 }
  0xcd   : > { %v2514_v28 = vld.sshfl [vmem:[#allocation1 + $0x8] sm:$0xff pattern:$0x75316420]  ;;  %v2513_v29 = vld.sshfl [vmem:[#allocation1] sm:$0xff pattern:$0x75316420] }
  0xce   : > { %2519 = vrot.lane.b32.xlu0 %v2514_v28, %s3281_s13  ;;  %2517 = vrot.lane.b32.xlu2 %v2513_v29, %s3281_s13  ;;  %2833 = vst [vmem:[#allocation1] ss:$2 sm:$0xff] %v275_v13  ;;  %v935_v28 = vperm.slane %v3366_v42, 2 }
  0xd5   : > { %v2835_v31 = vld.sshfl [vmem:[#allocation1 + $0x8] sm:$0xff pattern:$0x75316420]  ;;  %v2834_v32 = vld.sshfl [vmem:[#allocation1] sm:$0xff pattern:$0x75316420] }
  0xd6   : > { %3157 = vperm.xlu0 %3262, %v3154_v30   ;;  %2840 = vrot.lane.b32.xlu2 %v2835_v31, %s3282_s16  ;;  %v650_v31 = vsub.f32 %v3399_v17, %v3405_v20 }
  0xd7   : > { %2838 = vrot.lane.b32.xlu1 %v2834_v32, %s3282_s16 }
  0xd8   : > { %v651_v37 = vand.u32 4294901760, %v650_v31 }
  0xf0   : > { %v287_v35 = vpop.permute.xlu2 %286 }
  0xf8   : > { %v289_v44 = vpop.permute.xlu2 %288 }
  0xf9   : > { %v293_v49 = vsel %vm292_vm1, %v287_v35, %v289_v44  ;;  %v294_v50 = vsel %vm292_vm1, %v289_v44, %v287_v35 }
  0xfa   : > { %v297_v57 = vmul.f32 %v295_v47, %v294_v50  ;;  %v298_v58 = vmul.f32 %v296_v48, %v293_v49 }
  0xfc   : > { %v625_v1 = vsel %vm322_vm3, %v297_v57, 0  ;;  %v628_v2 = vsel %vm322_vm3, %v298_v58, 0  ;;  %v1255_v57 = vperm.slane %v3361_v41, 3  ;;  %v1256_v58 = vperm.slane %v3366_v42, 3 }
  0xfd   : > { %v3388_v6 = vand.u32 4294901760, %v625_v1  ;;  %v3390_v7 = vand.u32 4294901760, %v628_v2 }
  0xff   : > { %v672_v11 = vsub.f32 %v625_v1, %v3388_v6  ;;  %v818_v12 = vsub.f32 %v628_v2, %v3390_v7 }
 0x101   : > { %v673_v18 = vand.u32 4294901760, %v672_v11  ;;  %v819_v19 = vand.u32 4294901760, %v818_v12 }
 0x103   : > { %v674_v24 = vsub.f32 %v672_v11, %v673_v18  ;;  %v820_v25 = vsub.f32 %v818_v12, %v819_v19 }
 0x105   : > { %v675_v32 = vand.u32 4294901760, %v674_v24  ;;  %v821_v33 = vand.u32 4294901760, %v820_v25  ;;  %v3235_v24 = vld [vmem:[%s3723_s1 + $0x10] sm:$0x7]  ;;  %v1572_v25 = vsel %vm322_vm3, %v3340_v22, 0 }
 0x110   : > { %v306_v38 = vpop.permute.xlu1 %305 }
 0x118   : > { %v308_v51 = vpop.permute.xlu1 %307  ;;  %v928_v26 = vpop.permute.xlu0 %927 }
 0x119   : > { %v310_v53 = vsel %vm309_vm2, %v306_v38, %v308_v51  ;;  %v311_v54 = vsel %vm309_vm2, %v308_v51, %v306_v38  ;;  %v3233_v38 = vld [vmem:[%s3723_s1 + $0x8] sm:$0x7] }
 0x11a   : > { %v314_v55 = vmul.f32 %v312_v45, %v311_v54  ;;  %v315_v56 = vmul.f32 %v313_v46, %v310_v53  ;;  %v941_v45 = vsel %vm318_vm0, %v3233_v38, 0 }
 0x11c   : > { %v324_v59 = vsel %vm322_vm3, %v314_v55, 0  ;;  %v327_v60 = vsel %vm322_vm3, %v315_v56, 0  ;;  %v1249_v56 = vpop.permute.xlu2 %1248 }
 0x11d   : > { %v344_v62 = vand.u32 4294901760, %v324_v59  ;;  %v490_v63 = vand.u32 4294901760, %v327_v60 }
 0x11f   : > { %v517_v3 = vsub.f32 %v327_v60, %v490_v63  ;;  %345 = vmatpush.msra.mxu0 %v344_v62  ;;  %421 = vmatpush.msra.mxu3 %v344_v62  ;;  %v371_v4 = vsub.f32 %v324_v59, %v344_v62 }
 0x120   : > { %351 = vmatmul.f32.vlgmr.msra.gmra.mxu0 %v350_v61  ;;  %425 = vmatmul.f32.vlgmr.msra.gmra.mxu3 %v3369_v43  ;;  %v930_v21 = vpop.permute.xlu1 %929  ;;  %v1251_v53 = vpop.permute.xlu0 %1250 }
 0x121   : > { %398 = vmatpush.msra.mxu2 %v371_v4  ;;  %v372_v8 = vand.u32 4294901760, %v371_v4  ;;  %v518_v9 = vand.u32 4294901760, %v517_v3  ;;  %v932_v29 = vsel %vm931_vm4, %v928_v26, %v930_v21  ;;  %v933_v30 = vsel %vm931_vm4, %v930_v21, %v928_v26 }
 0x122   : > { %401 = vmatmul.f32.vlgmr.msra.gmra.mxu2 %v3354_v39  ;;  %v936_v34 = vmul.f32 %v934_v27, %v933_v30  ;;  %v937_v35 = vmul.f32 %v935_v28, %v932_v29  ;;  %v1253_v59 = vsel %vm1252_vm5, %v1249_v56, %v1251_v53  ;;  %v1254_v60 = vsel %vm1252_vm5, %v1251_v53, %v1249_v56 }
 0x123   : > { %491 = vmatpush.msrb.mxu2 %v490_v63  ;;  %447 = vmatpush.msrb.mxu0 %v372_v8  ;;  %v373_v13 = vsub.f32 %v371_v4, %v372_v8  ;;  %v519_v14 = vsub.f32 %v517_v3, %v518_v9  ;;  %v1257_v0 = vmul.f32 %v1255_v57, %v1254_v60  ;;  %v1574_v26 = vsel %vm322_vm3, %v3342_v23, 0 }
 0x124   : > { %v947_v44 = vsel %vm322_vm3, %v937_v35, 0  ;;  %v1258_v1 = vmul.f32 %v1256_v58, %v1253_v59  ;;  %v1570_v27 = vsel %vm318_vm0, %v3235_v24, 0  ;;  %v1591_v28 = vand.u32 4294901760, %v1572_v25 }
 0x125   : > { %593 = vmatpush.msra.mxu2 %v518_v9  ;;  %544 = vmatpush.msra.mxu0 %v517_v3  ;;  %v374_v15 = vand.u32 4294901760, %v373_v13  ;;  %v520_v16 = vand.u32 4294901760, %v519_v14  ;;  %v3424_v47 = vand.u32 4294901760, %v947_v44  ;;  %v3234_v3 = vld [vmem:[%s3723_s1 + $0xc] sm:$0x7]  ;;  %v1265_v4 = vsel %vm322_vm3, %v1257_v0, 0 }
 0x126   : > { %v1268_v5 = vsel %vm322_vm3, %v1258_v1, 0  ;;  %v3490_v29 = vand.u32 4294901760, %v1574_v26  ;;  %v3494_v30 = vand.u32 4294901760, %v1570_v27  ;;  %v1618_v22 = vsub.f32 %v1572_v25, %v1591_v28 }
 0x127   : > { %375 = vmatpush.msra.mxu1 %v374_v15  ;;  %521 = vmatpush.msrb.mxu3 %v520_v16  ;;  %v1137_v49 = vsub.f32 %v947_v44, %v3424_v47  ;;  %v1431_v8 = vand.u32 4294901760, %v1268_v5  ;;  %v1882_v44 = vperm.slane %v3361_v41, 5 }
 0x128   : > { %449 = vmatmul.f32.vlgmr.msrb.gmra.mxu0 %v3351_v36  ;;  %377 = vmatmul.f32.vlgmr.msra.gmra.mxu1 %v3351_v36  ;;  %v1764_v23 = vsub.f32 %v1574_v26, %v3490_v29  ;;  %v3500_v31 = vsub.f32 %v1570_v27, %v3494_v30 }
 0x129   : > { %646 = vmatpush.msrb.mxu0 %v3388_v6  ;;  %523 = vmatmul.f32.vlgmr.msrb.gmra.mxu3 %v3351_v36  ;;  %v1138_v51 = vand.u32 4294901760, %v1137_v49 }
 0x12a   : > { %469 = vmatpush.msrb.mxu1 %v344_v62  ;;  %615 = vmatpush.msra.mxu3 %v490_v63 }
 0x12b   : > { %497 = vmatmul.f32.vlgmr.msrb.gmra.mxu2 %v350_v61  ;;  %v1139_v55 = vsub.f32 %v1137_v49, %v1138_v51 }
 0x12c   : > { %567 = vmatpush.msra.mxu1 %v490_v63  ;;  %722 = vmatpush.msrb.mxu3 %v3388_v6 }
 0x12d   : > { %699 = vmatpush.msrb.mxu2 %v672_v11  ;;  %v1140_v63 = vand.u32 4294901760, %v1139_v55  ;;  %v1458_v11 = vsub.f32 %v1268_v5, %v1431_v8  ;;  %v2203_v5 = vperm.slane %v3361_v41, 6 }
 0x12f   : > { %v1459_v14 = vand.u32 4294901760, %v1458_v11 }
 0x130   : > { %547 = vmatmul.f32.vlgmr.msra.gmra.mxu0 %v3354_v39  ;;  %471 = vmatmul.f32.vlgmr.msrb.gmra.mxu1 %v3351_v36  ;;  %v944_v39 = vsel %vm322_vm3, %v936_v34, 0  ;;  %v3505_v34 = vand.u32 4294901760, %v3500_v31  ;;  %v1876_v35 = vpop.permute.xlu1 %1875 }
 0x131   : > { %748 = vmatpush.msra.mxu0 %v673_v18  ;;  %617 = vmatmul.f32.vlgmr.msra.gmra.mxu3 %v3351_v36  ;;  %v964_v46 = vand.u32 4294901760, %v944_v39 }
 0x132   : > { %676 = vmatpush.msrb.mxu1 %v675_v32  ;;  %822 = vmatpush.msra.mxu3 %v821_v33  ;;  %v1619_v32 = vand.u32 4294901760, %v1618_v22  ;;  %v1765_v33 = vand.u32 4294901760, %v1764_v23 }
 0x133   : > { %595 = vmatmul.f32.vlgmr.msra.gmra.mxu2 %v3351_v36  ;;  %v3430_v36 = vand.u32 4294901760, %v941_v45  ;;  %v991_v48 = vsub.f32 %v944_v39, %v964_v46  ;;  %v1878_v39 = vpop.permute.xlu2 %1877 }
 0x134   : > { %792 = vmatpush.msra.mxu2 %v3390_v7  ;;  %v1766_v38 = vsub.f32 %v1764_v23, %v1765_v33 }
 0x135   : > { %v3436_v50 = vsub.f32 %v941_v45, %v3430_v36  ;;  %v1883_v45 = vperm.slane %v3366_v42, 5 }
 0x137   : > { %v3442_v52 = vand.u32 4294901760, %v3436_v50 }
 0x138   : > { %652 = vmatmul.f32.vlgmr.msrb.gmra.mxu0 %v651_v37  ;;  %571 = vmatmul.f32.vlgmr.msra.gmra.mxu1 %v3369_v43  ;;  %v992_v43 = vand.u32 4294901760, %v991_v48  ;;  %v2199_v1 = vpop.permute.xlu1 %2198 }
 0x139   : > { %845 = vmatpush.msrb.mxu0 %v818_v12  ;;  %726 = vmatmul.f32.vlgmr.msrb.gmra.mxu3 %v3405_v20  ;;  %v969_v61 = vsub.f32 %v3436_v50, %v3442_v52 }
 0x13a   : > { %770 = vmatpush.msra.mxu1 %v3388_v6  ;;  %916 = vmatpush.msrb.mxu3 %v3390_v7  ;;  %v993_v54 = vsub.f32 %v991_v48, %v992_v43  ;;  %v1262_v6 = vsel %vm318_vm0, %v3234_v3, 0 }
 0x13b   : > { %702 = vmatmul.f32.vlgmr.msrb.gmra.mxu2 %v3399_v17  ;;  %v970_v2 = vand.u32 4294901760, %v969_v61  ;;  %v3463_v9 = vand.u32 4294901760, %v1262_v6 }
 0x13c   : > { %894 = vmatpush.msrb.mxu2 %v819_v19  ;;  %v994_v62 = vand.u32 4294901760, %v993_v54 }
 0x13d   : > { %v3468_v12 = vsub.f32 %v1262_v6, %v3463_v9  ;;  %v2204_v6 = vperm.slane %v3366_v42, 6 }
 0x13f   : > { %v3474_v15 = vand.u32 4294901760, %v3468_v12 }
 0x140   : > { %750 = vmatmul.f32.vlgmr.msra.gmra.mxu0 %v3393_v10  ;;  %678 = vmatmul.f32.vlgmr.msrb.gmra.mxu1 %v3393_v10 }
 0x141   : > { %965 = vmatpush.msra.mxu0 %v964_v46  ;;  %824 = vmatmul.f32.vlgmr.msra.gmra.mxu3 %v3393_v10  ;;  %v1290_v18 = vsub.f32 %v3468_v12, %v3474_v15 }
 0x142   : > { %868 = vmatpush.msrb.mxu1 %v3390_v7  ;;  %1041 = vmatpush.msra.mxu3 %v964_v46  ;;  %v1285_v7 = vand.u32 4294901760, %v1265_v4 }
 0x143   : > { %798 = vmatmul.f32.vlgmr.msra.gmra.mxu2 %v651_v37  ;;  %v1291_v21 = vand.u32 4294901760, %v1290_v18  ;;  %v1620_v37 = vsub.f32 %v1618_v22, %v1619_v32 }
 0x144   : > { %1018 = vmatpush.msra.mxu2 %v991_v48 }
 0x145   : > { %v1621_v48 = vand.u32 4294901760, %v1620_v37  ;;  %v2525_v37 = vperm.slane %v3366_v42, 7 }
 0x148   : > { %848 = vmatmul.f32.vlgmr.msrb.gmra.mxu0 %v3399_v17  ;;  %772 = vmatmul.f32.vlgmr.msra.gmra.mxu1 %v3393_v10  ;;  %v1460_v17 = vsub.f32 %v1458_v11, %v1459_v14 }
 0x149   : > { %1067 = vmatpush.msrb.mxu0 %v992_v43  ;;  %918 = vmatmul.f32.vlgmr.msrb.gmra.mxu3 %v3393_v10 }
 0x14a   : > { %995 = vmatpush.msra.mxu1 %v994_v62  ;;  %1141 = vmatpush.msrb.mxu3 %v1140_v63 }
 0x14b   : > { %896 = vmatmul.f32.vlgmr.msrb.gmra.mxu2 %v3393_v10  ;;  %v1312_v10 = vsub.f32 %v1265_v4, %v1285_v7 }
 0x14c   : > { %1111 = vmatpush.msrb.mxu2 %v3424_v47 }
 0x14d   : > { %v1313_v13 = vand.u32 4294901760, %v1312_v10 }
 0x14f   : > { %v1314_v16 = vsub.f32 %v1312_v10, %v1313_v13 }
 0x150   : > { %971 = vmatmul.f32.vlgmr.msra.gmra.mxu0 %v970_v2  ;;  %872 = vmatmul.f32.vlgmr.msrb.gmra.mxu1 %v3405_v20  ;;  %v1461_v20 = vand.u32 4294901760, %v1460_v17 }
 0x151   : > { %1164 = vmatpush.msra.mxu0 %v1137_v49  ;;  %1045 = vmatmul.f32.vlgmr.msra.gmra.mxu3 %v3442_v52  ;;  %v1315_v19 = vand.u32 4294901760, %v1314_v16  ;;  %v1767_v49 = vand.u32 4294901760, %v1766_v38 }
 0x152   : > { %1089 = vmatpush.msrb.mxu1 %v964_v46  ;;  %1235 = vmatpush.msra.mxu3 %v3424_v47  ;;  %v1880_v46 = vsel %vm1879_vm6, %v1876_v35, %v1878_v39 }
 0x153   : > { %1021 = vmatmul.f32.vlgmr.msra.gmra.mxu2 %v3436_v50 }
 0x154   : > { %1213 = vmatpush.msra.mxu2 %v1138_v51 }
 0x158   : > { %1069 = vmatmul.f32.vlgmr.msrb.gmra.mxu0 %v3430_v36  ;;  %997 = vmatmul.f32.vlgmr.msra.gmra.mxu1 %v3430_v36 }
 0x159   : > { %1286 = vmatpush.msrb.mxu0 %v1285_v7  ;;  %1143 = vmatmul.f32.vlgmr.msrb.gmra.mxu3 %v3430_v36 }
 0x15a   : > { %1187 = vmatpush.msra.mxu1 %v3424_v47  ;;  %1362 = vmatpush.msrb.mxu3 %v1285_v7  ;;  %v1881_v47 = vsel %vm1879_vm6, %v1878_v39, %v1876_v35  ;;  %v2524_v35 = vperm.slane %v3361_v41, 7 }
 0x15b   : > { %1117 = vmatmul.f32.vlgmr.msrb.gmra.mxu2 %v970_v2  ;;  %v1885_v43 = vmul.f32 %v1883_v45, %v1881_v47  ;;  %v2197_v2 = vpop.permute.xlu0 %2196 }
 0x15c   : > { %1339 = vmatpush.msrb.mxu2 %v1312_v10 }
 0x15d   : > { %v1895_v54 = vsel %vm322_vm3, %v1885_v43, 0 }
 0x15e   : > { %v3523_v57 = vand.u32 4294901760, %v1895_v54 }
 0x160   : > { %1167 = vmatmul.f32.vlgmr.msra.gmra.mxu0 %v3436_v50  ;;  %1091 = vmatmul.f32.vlgmr.msrb.gmra.mxu1 %v3430_v36  ;;  %v1884_v50 = vmul.f32 %v1882_v44, %v1880_v46  ;;  %v2085_v60 = vsub.f32 %v1895_v54, %v3523_v57 }
 0x161   : > { %1388 = vmatpush.msra.mxu0 %v1313_v13  ;;  %1237 = vmatmul.f32.vlgmr.msra.gmra.mxu3 %v3430_v36 }
 0x162   : > { %1316 = vmatpush.msrb.mxu1 %v1315_v19  ;;  %1462 = vmatpush.msra.mxu3 %v1461_v20  ;;  %v1892_v53 = vsel %vm322_vm3, %v1884_v50, 0  ;;  %v2086_v63 = vand.u32 4294901760, %v2085_v60 }
 0x163   : > { %1215 = vmatmul.f32.vlgmr.msra.gmra.mxu2 %v3430_v36  ;;  %v1596_v36 = vsub.f32 %v3500_v31, %v3505_v34  ;;  %v1912_v56 = vand.u32 4294901760, %v1892_v53 }
 0x164   : > { %1432 = vmatpush.msra.mxu2 %v1431_v8  ;;  %v2087_v4 = vsub.f32 %v2085_v60, %v2086_v63 }
 0x165   : > { %v1597_v51 = vand.u32 4294901760, %v1596_v36  ;;  %v1939_v59 = vsub.f32 %v1892_v53, %v1912_v56  ;;  %v3238_v53 = vld [vmem:[%s3723_s1 + $0x1c] sm:$0x7] }
 0x167   : > { %v1940_v62 = vand.u32 4294901760, %v1939_v59 }
 0x168   : > { %1292 = vmatmul.f32.vlgmr.msrb.gmra.mxu0 %v1291_v21  ;;  %1191 = vmatmul.f32.vlgmr.msra.gmra.mxu1 %v3442_v52  ;;  %v3236_v52 = vld [vmem:[%s3723_s1 + $0x14] sm:$0x7] }
 0x169   : > { %1485 = vmatpush.msrb.mxu0 %v1458_v11  ;;  %1366 = vmatmul.f32.vlgmr.msrb.gmra.mxu3 %v3474_v15  ;;  %v1889_v55 = vsel %vm318_vm0, %v3236_v52, 0  ;;  %v1941_v3 = vsub.f32 %v1939_v59, %v1940_v62  ;;  %v2088_v11 = vand.u32 4294901760, %v2087_v4 }
 0x16a   : > { %1410 = vmatpush.msra.mxu1 %v1285_v7  ;;  %1556 = vmatpush.msrb.mxu3 %v1431_v8  ;;  %v3528_v58 = vand.u32 4294901760, %v1889_v55  ;;  %v2201_v7 = vsel %vm2200_vm7, %v2197_v2, %v2199_v1 }
 0x16b   : > { %1342 = vmatmul.f32.vlgmr.msrb.gmra.mxu2 %v3468_v12  ;;  %v1942_v10 = vand.u32 4294901760, %v1941_v3 }
 0x16c   : > { %1534 = vmatpush.msrb.mxu2 %v1459_v14  ;;  %v3534_v61 = vsub.f32 %v1889_v55, %v3528_v58 }
 0x16e   : > { %v3540_v0 = vand.u32 4294901760, %v3534_v61 }
 0x170   : > { %1390 = vmatmul.f32.vlgmr.msra.gmra.mxu0 %v3463_v9  ;;  %1318 = vmatmul.f32.vlgmr.msrb.gmra.mxu1 %v3463_v9 }
 0x171   : > { %1592 = vmatpush.msra.mxu0 %v1591_v28  ;;  %1464 = vmatmul.f32.vlgmr.msra.gmra.mxu3 %v3463_v9 }
 0x172   : > { %1508 = vmatpush.msrb.mxu1 %v1431_v8  ;;  %1668 = vmatpush.msra.mxu3 %v1591_v28  ;;  %v2202_v8 = vsel %vm2200_vm7, %v2199_v1, %v2197_v2 }
 0x173   : > { %1438 = vmatmul.f32.vlgmr.msra.gmra.mxu2 %v1291_v21  ;;  %v2206_v13 = vmul.f32 %v2204_v6, %v2202_v8 }
 0x174   : > { %1645 = vmatpush.msra.mxu2 %v1618_v22 }
 0x175   : > { %v2216_v17 = vsel %vm322_vm3, %v2206_v13, 0 }
 0x176   : > { %v3560_v20 = vand.u32 4294901760, %v2216_v17 }
 0x178   : > { %1488 = vmatmul.f32.vlgmr.msrb.gmra.mxu0 %v3468_v12  ;;  %1412 = vmatmul.f32.vlgmr.msra.gmra.mxu1 %v3463_v9  ;;  %v2205_v12 = vmul.f32 %v2203_v5, %v2201_v7  ;;  %v3569_v26 = vsub.f32 %v2216_v17, %v3560_v20 }
 0x179   : > { %1694 = vmatpush.msrb.mxu0 %v1619_v32  ;;  %1558 = vmatmul.f32.vlgmr.msrb.gmra.mxu3 %v3463_v9 }
 0x17a   : > { %1622 = vmatpush.msra.mxu1 %v1621_v48  ;;  %1768 = vmatpush.msrb.mxu3 %v1767_v49  ;;  %v2213_v16 = vsel %vm322_vm3, %v2205_v12, 0 }
 0x17b   : > { %1536 = vmatmul.f32.vlgmr.msrb.gmra.mxu2 %v3463_v9  ;;  %v1917_v9 = vsub.f32 %v3534_v61, %v3540_v0  ;;  %v3558_v19 = vand.u32 4294901760, %v2213_v16 }
 0x17c   : > { %1738 = vmatpush.msrb.mxu2 %v3490_v29 }
 0x17d   : > { %v1918_v14 = vand.u32 4294901760, %v1917_v9  ;;  %v2260_v25 = vsub.f32 %v2213_v16, %v3558_v19 }
 0x180   : > { %1598 = vmatmul.f32.vlgmr.msra.gmra.mxu0 %v1597_v51  ;;  %1512 = vmatmul.f32.vlgmr.msrb.gmra.mxu1 %v3474_v15  ;;  %v3237_v15 = vld [vmem:[%s3723_s1 + $0x18] sm:$0x7] }
 0x181   : > { %1791 = vmatpush.msra.mxu0 %v1764_v23  ;;  %1672 = vmatmul.f32.vlgmr.msra.gmra.mxu3 %v3505_v34  ;;  %v2210_v18 = vsel %vm318_vm0, %v3237_v15, 0  ;;  %v2520_v23 = vpop.permute.xlu0 %2519  ;;  %v2839_v15 = vpop.permute.xlu1 %2838 }
 0x182   : > { %1716 = vmatpush.msrb.mxu1 %v1591_v28  ;;  %1862 = vmatpush.msra.mxu3 %v3490_v29  ;;  %v3565_v21 = vand.u32 4294901760, %v2210_v18  ;;  %v2261_v28 = vand.u32 4294901760, %v2260_v25 }
 0x183   : > { %1648 = vmatmul.f32.vlgmr.msra.gmra.mxu2 %v3500_v31 }
 0x184   : > { %1840 = vmatpush.msra.mxu2 %v1765_v33  ;;  %v3574_v27 = vsub.f32 %v2210_v18, %v3565_v21  ;;  %v2262_v32 = vsub.f32 %v2260_v25, %v2261_v28 }
 0x186   : > { %v3583_v22 = vand.u32 4294901760, %v3574_v27  ;;  %v2263_v36 = vand.u32 4294901760, %v2262_v32 }
 0x188   : > { %1696 = vmatmul.f32.vlgmr.msrb.gmra.mxu0 %v3494_v30  ;;  %1624 = vmatmul.f32.vlgmr.msra.gmra.mxu1 %v3494_v30  ;;  %v2238_v46 = vsub.f32 %v3574_v27, %v3583_v22 }
 0x189   : > { %1913 = vmatpush.msrb.mxu0 %v1912_v56  ;;  %1770 = vmatmul.f32.vlgmr.msrb.gmra.mxu3 %v3494_v30 }
 0x18a   : > { %1814 = vmatpush.msra.mxu1 %v3490_v29  ;;  %1989 = vmatpush.msrb.mxu3 %v1912_v56  ;;  %v2407_v29 = vand.u32 4294901760, %v3569_v26  ;;  %v2239_v41 = vand.u32 4294901760, %v2238_v46 }
 0x18b   : > { %1744 = vmatmul.f32.vlgmr.msrb.gmra.mxu2 %v1597_v51 }
 0x18c   : > { %1966 = vmatpush.msrb.mxu2 %v1939_v59  ;;  %v2408_v33 = vsub.f32 %v3569_v26, %v2407_v29 }
 0x18e   : > { %v2409_v48 = vand.u32 4294901760, %v2408_v33 }
 0x190   : > { %1794 = vmatmul.f32.vlgmr.msra.gmra.mxu0 %v3500_v31  ;;  %1718 = vmatmul.f32.vlgmr.msrb.gmra.mxu1 %v3494_v30 }
 0x191   : > { %2015 = vmatpush.msra.mxu0 %v1940_v62  ;;  %1864 = vmatmul.f32.vlgmr.msra.gmra.mxu3 %v3494_v30 }
 0x192   : > { %1943 = vmatpush.msrb.mxu1 %v1942_v10  ;;  %2089 = vmatpush.msra.mxu3 %v2088_v11 }
 0x193   : > { %1842 = vmatmul.f32.vlgmr.msra.gmra.mxu2 %v3494_v30 }
 0x194   : > { %2059 = vmatpush.msra.mxu2 %v3523_v57 }
 0x198   : > { %1919 = vmatmul.f32.vlgmr.msrb.gmra.mxu0 %v1918_v14  ;;  %1818 = vmatmul.f32.vlgmr.msra.gmra.mxu1 %v3505_v34  ;;  %v2518_v34 = vpop.permute.xlu2 %2517 }
 0x199   : > { %2112 = vmatpush.msrb.mxu0 %v2085_v60  ;;  %1993 = vmatmul.f32.vlgmr.msrb.gmra.mxu3 %v3540_v0  ;;  %v2522_v39 = vsel %vm2521_vm8, %v2518_v34, %v2520_v23  ;;  %v2523_v44 = vsel %vm2521_vm8, %v2520_v23, %v2518_v34  ;;  %v2531_v60 = vsel %vm318_vm0, %v3238_v53, 0 }
 0x19a   : > { %2037 = vmatpush.msra.mxu1 %v1912_v56  ;;  %2183 = vmatpush.msrb.mxu3 %v3523_v57  ;;  %v2526_v49 = vmul.f32 %v2524_v35, %v2522_v39  ;;  %v2527_v50 = vmul.f32 %v2525_v37, %v2523_v44  ;;  %v3613_v2 = vand.u32 4294901760, %v2531_v60 }
 0x19b   : > { %1969 = vmatmul.f32.vlgmr.msrb.gmra.mxu2 %v3534_v61 }
 0x19c   : > { %2161 = vmatpush.msrb.mxu2 %v2086_v63  ;;  %v2534_v54 = vsel %vm322_vm3, %v2526_v49, 0  ;;  %v2537_v55 = vsel %vm322_vm3, %v2527_v50, 0  ;;  %v3624_v8 = vsub.f32 %v2531_v60, %v3613_v2 }
 0x19d   : > { %v352_v24 = vpop.f32.mrf.mxu0 }
 0x1a0   : > { %2017 = vmatmul.f32.vlgmr.msra.gmra.mxu0 %v3528_v58  ;;  %1945 = vmatmul.f32.vlgmr.msrb.gmra.mxu1 %v3528_v58 }
 0x1a1   : > { %2234 = vmatpush.msra.mxu0 %v3558_v19  ;;  %2091 = vmatmul.f32.vlgmr.msra.gmra.mxu3 %v3528_v58 }
 0x1a2   : > { %2135 = vmatpush.msrb.mxu1 %v3523_v57  ;;  %2310 = vmatpush.msra.mxu3 %v3558_v19 }
 0x1a3   : > { %v426_v30 = vpop.f32.mrf.mxu3  ;;  %2065 = vmatmul.f32.vlgmr.msra.gmra.mxu2 %v1918_v14  ;;  %v3633_v14 = vand.u32 4294901760, %v3624_v8 }
 0x1a4   : > { %2287 = vmatpush.msra.mxu2 %v2260_v25  ;;  %v2841_v25 = vpop.permute.xlu2 %2840 }
 0x1a5   : > { %v450_v31 = vpop.f32.mrf.mxu0  ;;  %v402_v38 = vpop.f32.mrf.mxu2  ;;  %v2843_v40 = vsel %vm2842_vm9, %v2839_v15, %v2841_v25 }
 0x1a6   : > { %v378_v45 = vpop.f32.mrf.mxu1 }
 0x1a7   : > { %v379_v47 = vadd.f32 %v378_v45, %v352_v24  ;;  %v3239_v45 = vld [vmem:[%s3723_s1 + $0x20] sm:$0x7] }
 0x1a8   : > { %2115 = vmatmul.f32.vlgmr.msrb.gmra.mxu0 %v3534_v61  ;;  %2039 = vmatmul.f32.vlgmr.msra.gmra.mxu1 %v3528_v58  ;;  %v3607_v61 = vand.u32 4294901760, %v2537_v55 }
 0x1a9   : > { %2336 = vmatpush.msrb.mxu0 %v2261_v28  ;;  %v403_v43 = vadd.f32 %v402_v38, %v379_v47  ;;  %2185 = vmatmul.f32.vlgmr.msrb.gmra.mxu3 %v3528_v58  ;;  %v2844_v28 = vsel %vm2842_vm9, %v2841_v25, %v2839_v15 }
 0x1aa   : > { %2264 = vmatpush.msra.mxu1 %v2263_v36  ;;  %2410 = vmatpush.msrb.mxu3 %v2409_v48  ;;  %v3617_v5 = vsub.f32 %v2537_v55, %v3607_v61 }
 0x1ab   : > { %v427_v42 = vadd.f32 %v426_v30, %v403_v43  ;;  %2163 = vmatmul.f32.vlgmr.msrb.gmra.mxu2 %v3528_v58  ;;  %v3605_v58 = vand.u32 4294901760, %v2534_v54  ;;  %v2559_v30 = vsub.f32 %v3624_v8, %v3633_v14 }
 0x1ac   : > { %v524_v52 = vpop.f32.mrf.mxu3  ;;  %2380 = vmatpush.msrb.mxu2 %v3560_v20  ;;  %v2728_v12 = vand.u32 4294901760, %v3617_v5 }
 0x1ad   : > { %v548_v51 = vpop.f32.mrf.mxu0  ;;  %v451_v56 = vadd.f32 %v450_v31, %v427_v42  ;;  %v2581_v4 = vsub.f32 %v2534_v54, %v3605_v58  ;;  %v2560_v38 = vand.u32 4294901760, %v2559_v30 }
 0x1ae   : > { %v472_v57 = vpop.f32.mrf.mxu1  ;;  %v498_v59 = vpop.f32.mrf.mxu2  ;;  %v2729_v24 = vsub.f32 %v3617_v5, %v2728_v12 }
 0x1af   : > { %v525_v62 = vadd.f32 %v524_v52, %v498_v59  ;;  %v473_v63 = vadd.f32 %v472_v57, %v451_v56  ;;  %v2582_v11 = vand.u32 4294901760, %v2581_v4 }
 0x1b0   : > { %2240 = vmatmul.f32.vlgmr.msra.gmra.mxu0 %v2239_v41  ;;  %2139 = vmatmul.f32.vlgmr.msrb.gmra.mxu1 %v3540_v0  ;;  %v2730_v33 = vand.u32 4294901760, %v2729_v24 }
 0x1b1   : > { %2433 = vmatpush.msra.mxu0 %v3569_v26  ;;  %2314 = vmatmul.f32.vlgmr.msra.gmra.mxu3 %v3583_v22  ;;  %v549_v1 = vadd.f32 %v548_v51, %v525_v62  ;;  %v3264_v26 = vld [vmem:[%s3727_s5 + $0x18] ss:$0 sm:$0xff] }
 0x1b2   : > { %2358 = vmatpush.msrb.mxu1 %v3558_v19  ;;  %2504 = vmatpush.msra.mxu3 %v3560_v20  ;;  %v2583_v19 = vsub.f32 %v2581_v4, %v2582_v11  ;;  %v2848_v35 = vmul.f32 %v3264_v26, %v2844_v28 }
 0x1b3   : > { %2290 = vmatmul.f32.vlgmr.msra.gmra.mxu2 %v3574_v27 }
 0x1b4   : > { %v618_v0 = vpop.f32.mrf.mxu3  ;;  %2482 = vmatpush.msra.mxu2 %v2407_v29  ;;  %v2584_v32 = vand.u32 4294901760, %v2583_v19  ;;  %v2858_v47 = vsel %vm322_vm3, %v2848_v35, 0 }
 0x1b5   : > { %v653_v3 = vpop.f32.mrf.mxu0 }
 0x1b6   : > { %v654_v6 = vadd.f32 %v653_v3, %v473_v63  ;;  %v572_v7 = vpop.f32.mrf.mxu1  ;;  %v596_v10 = vpop.f32.mrf.mxu2 }
 0x1b7   : > { %v573_v9 = vadd.f32 %v572_v7, %v549_v1 }
 0x1b8   : > { %2338 = vmatmul.f32.vlgmr.msrb.gmra.mxu0 %v3565_v21  ;;  %2266 = vmatmul.f32.vlgmr.msra.gmra.mxu1 %v3565_v21 }
 0x1b9   : > { %2555 = vmatpush.msrb.mxu0 %v3605_v58  ;;  %v597_v13 = vadd.f32 %v596_v10, %v573_v9  ;;  %2412 = vmatmul.f32.vlgmr.msrb.gmra.mxu3 %v3565_v21 }
 0x1ba   : > { %2456 = vmatpush.msra.mxu1 %v3560_v20  ;;  %2631 = vmatpush.msrb.mxu3 %v3605_v58  ;;  %v3263_v20 = vld [vmem:[%s3727_s5 + $0x10] ss:$0 sm:$0xff] }
 0x1bb   : > { %v619_v16 = vadd.f32 %v618_v0, %v597_v13  ;;  %2386 = vmatmul.f32.vlgmr.msrb.gmra.mxu2 %v2239_v41  ;;  %v2847_v34 = vmul.f32 %v3263_v20, %v2843_v40  ;;  %v3663_v41 = vand.u32 4294901760, %v2858_v47 }
 0x1bc   : > { %v727_v18 = vpop.f32.mrf.mxu3  ;;  %2608 = vmatpush.msrb.mxu2 %v2581_v4 }
 0x1bd   : > { %v751_v17 = vpop.f32.mrf.mxu0  ;;  %v2855_v46 = vsel %vm322_vm3, %v2847_v34, 0  ;;  %v3048_v55 = vsub.f32 %v2858_v47, %v3663_v41 }
 0x1be   : > { %v679_v29 = vpop.f32.mrf.mxu1  ;;  %v703_v31 = vpop.f32.mrf.mxu2  ;;  %v3661_v43 = vand.u32 4294901760, %v2855_v46 }
 0x1bf   : > { %v680_v23 = vadd.f32 %v679_v29, %v654_v6  ;;  %v3049_v63 = vand.u32 4294901760, %v3048_v55 }
 0x1c0   : > { %2436 = vmatmul.f32.vlgmr.msra.gmra.mxu0 %v3574_v27  ;;  %2360 = vmatmul.f32.vlgmr.msrb.gmra.mxu1 %v3565_v21  ;;  %v2902_v54 = vsub.f32 %v2855_v46, %v3661_v43 }
 0x1c1   : > { %2657 = vmatpush.msra.mxu0 %v2582_v11  ;;  %v704_v37 = vadd.f32 %v703_v31, %v680_v23  ;;  %2506 = vmatmul.f32.vlgmr.msra.gmra.mxu3 %v3565_v21  ;;  %v3050_v7 = vsub.f32 %v3048_v55, %v3049_v63 }
 0x1c2   : > { %2585 = vmatpush.msrb.mxu1 %v2584_v32  ;;  %2731 = vmatpush.msra.mxu3 %v2730_v33  ;;  %v2903_v62 = vand.u32 4294901760, %v2902_v54 }
 0x1c3   : > { %v728_v39 = vadd.f32 %v727_v18, %v704_v37  ;;  %2484 = vmatmul.f32.vlgmr.msra.gmra.mxu2 %v3565_v21  ;;  %v2852_v21 = vsel %vm318_vm0, %v3239_v45, 0  ;;  %v3051_v13 = vand.u32 4294901760, %v3050_v7 }
 0x1c4   : > { %v825_v44 = vpop.f32.mrf.mxu3  ;;  %2701 = vmatpush.msra.mxu2 %v3607_v61  ;;  %v3669_v52 = vand.u32 4294901760, %v2852_v21  ;;  %v2904_v0 = vsub.f32 %v2902_v54, %v2903_v62 }
 0x1c5   : > { %v849_v27 = vpop.f32.mrf.mxu0  ;;  %v752_v36 = vadd.f32 %v751_v17, %v728_v39 }
 0x1c6   : > { %v773_v48 = vpop.f32.mrf.mxu1  ;;  %v799_v50 = vpop.f32.mrf.mxu2  ;;  %v3678_v59 = vsub.f32 %v2852_v21, %v3669_v52 }
 0x1c7   : > { %v3657_v49 = vadd.f32 %v773_v48, %v752_v36  ;;  %v800_v42 = vadd.f32 %v799_v50, %v619_v16 }
 0x1c8   : > { %2561 = vmatmul.f32.vlgmr.msrb.gmra.mxu0 %v2560_v38  ;;  %2460 = vmatmul.f32.vlgmr.msra.gmra.mxu1 %v3583_v22  ;;  %v3686_v3 = vand.u32 4294901760, %v3678_v59 }
 0x1c9   : > { %2754 = vmatpush.msrb.mxu0 %v3617_v5  ;;  %2635 = vmatmul.f32.vlgmr.msrb.gmra.mxu3 %v3633_v14  ;;  %v826_v51 = vadd.f32 %v825_v44, %v800_v42 }
 0x1ca   : > { %2679 = vmatpush.msra.mxu1 %v3605_v58  ;;  %2825 = vmatpush.msrb.mxu3 %v3607_v61  ;;  %v2880_v10 = vsub.f32 %v3678_v59, %v3686_v3 }
 0x1cb   : > { %v850_v56 = vadd.f32 %v849_v27, %v826_v51  ;;  %2611 = vmatmul.f32.vlgmr.msrb.gmra.mxu2 %v3624_v8 }
 0x1cc   : > { %v919_v57 = vpop.f32.mrf.mxu3  ;;  %2803 = vmatpush.msrb.mxu2 %v2728_v12  ;;  %v2905_v12 = vand.u32 4294901760, %v2904_v0  ;;  %v2881_v16 = vand.u32 4294901760, %v2880_v10 }
 0x1cd   : > { %v972_v53 = vpop.f32.mrf.mxu0 }
 0x1ce   : > { %v873_v22 = vpop.f32.mrf.mxu1  ;;  %v897_v58 = vpop.f32.mrf.mxu2 }
 0x1cf   : > { %v874_v60 = vadd.f32 %v873_v22, %v850_v56 }
 0x1d0   : > { %2659 = vmatmul.f32.vlgmr.msra.gmra.mxu0 %v3613_v2  ;;  %2587 = vmatmul.f32.vlgmr.msrb.gmra.mxu1 %v3613_v2 }
 0x1d1   : > { %2876 = vmatpush.msra.mxu0 %v3661_v43  ;;  %v898_v1 = vadd.f32 %v897_v58, %v874_v60  ;;  %2733 = vmatmul.f32.vlgmr.msra.gmra.mxu3 %v3613_v2 }
 0x1d2   : > { %2777 = vmatpush.msrb.mxu1 %v3607_v61  ;;  %2952 = vmatpush.msra.mxu3 %v3661_v43 }
 0x1d3   : > { %v920_v4 = vadd.f32 %v919_v57, %v898_v1  ;;  %2707 = vmatmul.f32.vlgmr.msra.gmra.mxu2 %v2560_v38 }
 0x1d4   : > { %v1046_v6 = vpop.f32.mrf.mxu3  ;;  %2929 = vmatpush.msra.mxu2 %v2902_v54 }
 0x1d5   : > { %v1070_v5 = vpop.f32.mrf.mxu0 }
 0x1d6   : > { %v998_v9 = vpop.f32.mrf.mxu1  ;;  %v1022_v61 = vpop.f32.mrf.mxu2 }
 0x1d7   : > { %v999_v11 = vadd.f32 %v998_v9, %v972_v53 }
 0x1d8   : > { %2757 = vmatmul.f32.vlgmr.msrb.gmra.mxu0 %v3624_v8  ;;  %2681 = vmatmul.f32.vlgmr.msra.gmra.mxu1 %v3613_v2 }
 0x1d9   : > { %2978 = vmatpush.msrb.mxu0 %v2903_v62  ;;  %v1023_v15 = vadd.f32 %v1022_v61, %v999_v11  ;;  %2827 = vmatmul.f32.vlgmr.msrb.gmra.mxu3 %v3613_v2 }
 0x1da   : > { %2906 = vmatpush.msra.mxu1 %v2905_v12  ;;  %3052 = vmatpush.msrb.mxu3 %v3051_v13 }
 0x1db   : > { %v1047_v17 = vadd.f32 %v1046_v6, %v1023_v15  ;;  %2805 = vmatmul.f32.vlgmr.msrb.gmra.mxu2 %v3613_v2 }
 0x1dc   : > { %v1144_v8 = vpop.f32.mrf.mxu3  ;;  %3022 = vmatpush.msrb.mxu2 %v3663_v41 }
 0x1dd   : > { %v1168_v18 = vpop.f32.mrf.mxu0  ;;  %v1071_v19 = vadd.f32 %v1070_v5, %v1047_v17 }
 0x1de   : > { %v1092_v24 = vpop.f32.mrf.mxu1  ;;  %v1118_v20 = vpop.f32.mrf.mxu2 }
 0x1df   : > { %v1093_v25 = vadd.f32 %v1092_v24, %v1071_v19  ;;  %v1145_v26 = vadd.f32 %v1144_v8, %v1118_v20 }
 0x1e0   : > { %2882 = vmatmul.f32.vlgmr.msra.gmra.mxu0 %v2881_v16  ;;  %2781 = vmatmul.f32.vlgmr.msrb.gmra.mxu1 %v3633_v14 }
 0x1e1   : > { %3075 = vmatpush.msra.mxu0 %v3048_v55  ;;  %v1241_v40 = vadd.f32 %v1093_v25, %v3657_v49  ;;  %2956 = vmatmul.f32.vlgmr.msra.gmra.mxu3 %v3686_v3  ;;  %v1169_v2 = vadd.f32 %v1168_v18, %v1145_v26 }
 0x1e2   : > { %3000 = vmatpush.msrb.mxu1 %v3661_v43  ;;  %3146 = vmatpush.msra.mxu3 %v3663_v41 }
 0x1e3   : > { %2932 = vmatmul.f32.vlgmr.msra.gmra.mxu2 %v3678_v59 }
 0x1e4   : > { %v1238_v29 = vpop.f32.mrf.mxu3  ;;  %3124 = vmatpush.msra.mxu2 %v3049_v63 }
 0x1e5   : > { %v1293_v28 = vpop.f32.mrf.mxu0 }
 0x1e6   : > { %v1192_v30 = vpop.f32.mrf.mxu1  ;;  %v1216_v31 = vpop.f32.mrf.mxu2 }
 0x1e7   : > { %v1193_v23 = vadd.f32 %v1192_v30, %v1169_v2 }
 0x1e8   : > { %2980 = vmatmul.f32.vlgmr.msrb.gmra.mxu0 %v3669_v52  ;;  %2908 = vmatmul.f32.vlgmr.msra.gmra.mxu1 %v3669_v52 }
 0x1e9   : > { %v1217_v32 = vadd.f32 %v1216_v31, %v1193_v23  ;;  %3054 = vmatmul.f32.vlgmr.msrb.gmra.mxu3 %v3669_v52  ;;  %3098 = vmatpush.msra.mxu1 %v3663_v41 }
 0x1eb   : > { %v1239_v14 = vadd.f32 %v1238_v29, %v1217_v32  ;;  %3028 = vmatmul.f32.vlgmr.msrb.gmra.mxu2 %v2881_v16 }
 0x1ec   : > { %v1367_v34 = vpop.f32.mrf.mxu3 }
 0x1ed   : > { %v1391_v33 = vpop.f32.mrf.mxu0  ;;  %v1242_v35 = vadd.f32 %v1239_v14, %v920_v4 }
 0x1ee   : > { %v1319_v37 = vpop.f32.mrf.mxu1  ;;  %v1343_v39 = vpop.f32.mrf.mxu2 }
 0x1ef   : > { %v1320_v38 = vadd.f32 %v1319_v37, %v1293_v28 }
 0x1f0   : > { %3078 = vmatmul.f32.vlgmr.msra.gmra.mxu0 %v3678_v59  ;;  %3002 = vmatmul.f32.vlgmr.msrb.gmra.mxu1 %v3669_v52 }
 0x1f1   : > { %v1344_v27 = vadd.f32 %v1343_v39, %v1320_v38  ;;  %3148 = vmatmul.f32.vlgmr.msra.gmra.mxu3 %v3669_v52 }
 0x1f3   : > { %v1368_v44 = vadd.f32 %v1367_v34, %v1344_v27  ;;  %3126 = vmatmul.f32.vlgmr.msra.gmra.mxu2 %v3669_v52 }
 0x1f4   : > { %v1465_v46 = vpop.f32.mrf.mxu3 }
 0x1f5   : > { %v1489_v45 = vpop.f32.mrf.mxu0  ;;  %v1392_v47 = vadd.f32 %v1391_v33, %v1368_v44 }
 0x1f6   : > { %v1413_v36 = vpop.f32.mrf.mxu1  ;;  %v1439_v49 = vpop.f32.mrf.mxu2 }
 0x1f7   : > { %v1414_v48 = vadd.f32 %v1413_v36, %v1392_v47  ;;  %v1466_v50 = vadd.f32 %v1465_v46, %v1439_v49 }
 0x1f8   : > { %3102 = vmatmul.f32.vlgmr.msra.gmra.mxu1 %v3686_v3 }
 0x1f9   : > { %v1562_v21 = vadd.f32 %v1414_v48, %v1241_v40  ;;  %v1490_v43 = vadd.f32 %v1489_v45, %v1466_v50 }
 0x1fc   : > { %v1559_v42 = vpop.f32.mrf.mxu3 }
 0x1fd   : > { %v1599_v41 = vpop.f32.mrf.mxu0 }
 0x1fe   : > { %v1513_v51 = vpop.f32.mrf.mxu1  ;;  %v1537_v54 = vpop.f32.mrf.mxu2 }
 0x1ff   : > { %v1514_v53 = vadd.f32 %v1513_v51, %v1490_v43 }
 0x201   : > { %v1538_v55 = vadd.f32 %v1537_v54, %v1514_v53 }
 0x203   : > { %v1560_v56 = vadd.f32 %v1559_v42, %v1538_v55 }
 0x204   : > { %v1673_v22 = vpop.f32.mrf.mxu3 }
 0x205   : > { %v1697_v57 = vpop.f32.mrf.mxu0  ;;  %v1563_v52 = vadd.f32 %v1560_v56, %v1242_v35 }
 0x206   : > { %v1625_v59 = vpop.f32.mrf.mxu1  ;;  %v1649_v58 = vpop.f32.mrf.mxu2 }
 0x207   : > { %v1626_v60 = vadd.f32 %v1625_v59, %v1599_v41 }
 0x209   : > { %v1650_v62 = vadd.f32 %v1649_v58, %v1626_v60 }
 0x20b   : > { %v1674_v63 = vadd.f32 %v1673_v22, %v1650_v62 }
 0x20c   : > { %v1771_v4 = vpop.f32.mrf.mxu3 }
 0x20d   : > { %v1795_v1 = vpop.f32.mrf.mxu0  ;;  %v1698_v5 = vadd.f32 %v1697_v57, %v1674_v63 }
 0x20e   : > { %v1719_v3 = vpop.f32.mrf.mxu1  ;;  %v1745_v0 = vpop.f32.mrf.mxu2 }
 0x20f   : > { %v1720_v6 = vadd.f32 %v1719_v3, %v1698_v5  ;;  %v1772_v7 = vadd.f32 %v1771_v4, %v1745_v0 }
 0x211   : > { %v1868_v9 = vadd.f32 %v1720_v6, %v1562_v21  ;;  %v1796_v10 = vadd.f32 %v1795_v1, %v1772_v7 }
 0x214   : > { %v1865_v61 = vpop.f32.mrf.mxu3 }
 0x215   : > { %v1920_v11 = vpop.f32.mrf.mxu0 }
 0x216   : > { %v1819_v12 = vpop.f32.mrf.mxu1  ;;  %v1843_v15 = vpop.f32.mrf.mxu2 }
 0x217   : > { %v1820_v13 = vadd.f32 %v1819_v12, %v1796_v10 }
 0x219   : > { %v1844_v16 = vadd.f32 %v1843_v15, %v1820_v13 }
 0x21b   : > { %v1866_v17 = vadd.f32 %v1865_v61, %v1844_v16 }
 0x21c   : > { %v1994_v8 = vpop.f32.mrf.mxu3 }
 0x21d   : > { %v2018_v18 = vpop.f32.mrf.mxu0  ;;  %v1869_v19 = vadd.f32 %v1866_v17, %v1563_v52 }
 0x21e   : > { %v1946_v24 = vpop.f32.mrf.mxu1  ;;  %v1970_v20 = vpop.f32.mrf.mxu2 }
 0x21f   : > { %v1947_v25 = vadd.f32 %v1946_v24, %v1920_v11 }
 0x221   : > { %v1971_v26 = vadd.f32 %v1970_v20, %v1947_v25 }
 0x223   : > { %v1995_v40 = vadd.f32 %v1994_v8, %v1971_v26 }
 0x224   : > { %v2092_v28 = vpop.f32.mrf.mxu3 }
 0x225   : > { %v2116_v2 = vpop.f32.mrf.mxu0  ;;  %v2019_v29 = vadd.f32 %v2018_v18, %v1995_v40 }
 0x226   : > { %v2040_v30 = vpop.f32.mrf.mxu1  ;;  %v2066_v31 = vpop.f32.mrf.mxu2 }
 0x227   : > { %v2041_v23 = vadd.f32 %v2040_v30, %v2019_v29  ;;  %v2093_v32 = vadd.f32 %v2092_v28, %v2066_v31 }
 0x229   : > { %v3710_v14 = vadd.f32 %v2041_v23, %v1868_v9  ;;  %v2117_v33 = vadd.f32 %v2116_v2, %v2093_v32 }
 0x22c   : > { %v2186_v35 = vpop.f32.mrf.mxu3 }
 0x22d   : > { %v2241_v34 = vpop.f32.mrf.mxu0 }
 0x22e   : > { %v2140_v37 = vpop.f32.mrf.mxu1  ;;  %v2164_v39 = vpop.f32.mrf.mxu2 }
 0x22f   : > { %v2141_v38 = vadd.f32 %v2140_v37, %v2117_v33 }
 0x231   : > { %v2165_v27 = vadd.f32 %v2164_v39, %v2141_v38 }
 0x233   : > { %v2187_v44 = vadd.f32 %v2186_v35, %v2165_v27 }
 0x234   : > { %v2315_v46 = vpop.f32.mrf.mxu3 }
 0x235   : > { %v2339_v45 = vpop.f32.mrf.mxu0  ;;  %v2190_v47 = vadd.f32 %v2187_v44, %v1869_v19 }
 0x236   : > { %v2267_v36 = vpop.f32.mrf.mxu1  ;;  %v2291_v48 = vpop.f32.mrf.mxu2 }
 0x237   : > { %v2268_v5 = vadd.f32 %v2267_v36, %v2241_v34 }
 0x239   : > { %v2292_v10 = vadd.f32 %v2291_v48, %v2268_v5 }
 0x23b   : > { %v2316_v15 = vadd.f32 %v2315_v46, %v2292_v10 }
 0x23c   : > { %v2413_v50 = vpop.f32.mrf.mxu3 }
 0x23d   : > { %v2437_v49 = vpop.f32.mrf.mxu0  ;;  %v2340_v26 = vadd.f32 %v2339_v45, %v2316_v15 }
 0x23e   : > { %v2361_v21 = vpop.f32.mrf.mxu1  ;;  %v2387_v43 = vpop.f32.mrf.mxu2 }
 0x23f   : > { %v2414_v6 = vadd.f32 %v2413_v50, %v2387_v43  ;;  %v2362_v31 = vadd.f32 %v2361_v21, %v2340_v26 }
 0x241   : > { %v2438_v12 = vadd.f32 %v2437_v49, %v2414_v6  ;;  %v2510_v46 = vadd.f32 %v2362_v31, %v3710_v14 }
 0x244   : > { %v2507_v42 = vpop.f32.mrf.mxu3 }
 0x245   : > { %v2562_v41 = vpop.f32.mrf.mxu0 }
 0x246   : > { %v2461_v51 = vpop.f32.mrf.mxu1  ;;  %v2485_v53 = vpop.f32.mrf.mxu2 }
 0x247   : > { %v2462_v16 = vadd.f32 %v2461_v51, %v2438_v12 }
 0x249   : > { %v2486_v40 = vadd.f32 %v2485_v53, %v2462_v16 }
 0x24b   : > { %v2508_v32 = vadd.f32 %v2507_v42, %v2486_v40  ;;  %v3158_v42 = vpop.permute.xlu0 %3157 }
 0x24c   : > { %v2636_v55 = vpop.f32.mrf.mxu3 }
 0x24d   : > { %v2660_v54 = vpop.f32.mrf.mxu0  ;;  %v2511_v45 = vadd.f32 %v2508_v32, %v2190_v47 }
 0x24e   : > { %v2588_v56 = vpop.f32.mrf.mxu1  ;;  %v2612_v57 = vpop.f32.mrf.mxu2 }
 0x24f   : > { %v2589_v0 = vadd.f32 %v2588_v56, %v2562_v41 }
 0x251   : > { %v2613_v13 = vadd.f32 %v2612_v57, %v2589_v0 }
 0x253   : > { %v2637_v24 = vadd.f32 %v2636_v55, %v2613_v13 }
 0x254   : > { %v2734_v22 = vpop.f32.mrf.mxu3 }
 0x255   : > { %v2758_v52 = vpop.f32.mrf.mxu0  ;;  %v2661_v30 = vadd.f32 %v2660_v54, %v2637_v24 }
 0x256   : > { %v2682_v59 = vpop.f32.mrf.mxu1  ;;  %v2708_v60 = vpop.f32.mrf.mxu2 }
 0x257   : > { %v2735_v11 = vadd.f32 %v2734_v22, %v2708_v60  ;;  %v2683_v37 = vadd.f32 %v2682_v59, %v2661_v30 }
 0x259   : > { %v2759_v17 = vadd.f32 %v2758_v52, %v2735_v11  ;;  %v2831_v49 = vadd.f32 %v2683_v37, %v2510_v46 }
 0x25c   : > { %v2828_v58 = vpop.f32.mrf.mxu3 }
 0x25d   : > { %v2883_v63 = vpop.f32.mrf.mxu0 }
 0x25e   : > { %v2782_v62 = vpop.f32.mrf.mxu1  ;;  %v2806_v1 = vpop.f32.mrf.mxu2 }
 0x25f   : > { %v2783_v25 = vadd.f32 %v2782_v62, %v2759_v17 }
 0x261   : > { %v2807_v23 = vadd.f32 %v2806_v1, %v2783_v25 }
 0x263   : > { %v2829_v38 = vadd.f32 %v2828_v58, %v2807_v23 }
 0x264   : > { %v2957_v4 = vpop.f32.mrf.mxu3 }
 0x265   : > { %v2981_v9 = vpop.f32.mrf.mxu0  ;;  %v2832_v50 = vadd.f32 %v2829_v38, %v2511_v45 }
 0x266   : > { %v2909_v3 = vpop.f32.mrf.mxu1  ;;  %v2933_v7 = vpop.f32.mrf.mxu2 }
 0x267   : > { %v2910_v61 = vadd.f32 %v2909_v3, %v2883_v63 }
 0x269   : > { %v2934_v18 = vadd.f32 %v2933_v7, %v2910_v61 }
 0x26b   : > { %v2958_v2 = vadd.f32 %v2957_v4, %v2934_v18 }
 0x26c   : > { %v3055_v19 = vpop.f32.mrf.mxu3 }
 0x26d   : > { %v3079_v29 = vpop.f32.mrf.mxu0  ;;  %v2982_v33 = vadd.f32 %v2981_v9, %v2958_v2 }
 0x26e   : > { %v3003_v8 = vpop.f32.mrf.mxu1  ;;  %v3029_v20 = vpop.f32.mrf.mxu2 }
 0x26f   : > { %v3056_v28 = vadd.f32 %v3055_v19, %v3029_v20  ;;  %v3004_v36 = vadd.f32 %v3003_v8, %v2982_v33 }
 0x271   : > { %v3080_v34 = vadd.f32 %v3079_v29, %v3056_v28  ;;  %v3152_v41 = vadd.f32 %v3004_v36, %v2831_v49 }
 0x273   : > { %v3160_v53 = vadd.f32 %v3158_v42, %v3152_v41 }
 0x274   : > { %v3149_v44 = vpop.f32.mrf.mxu3 }
 0x276   : > { %v3103_v35 = vpop.f32.mrf.mxu1  ;;  %v3127_v27 = vpop.f32.mrf.mxu2 }
 0x277   : > { %v3104_v39 = vadd.f32 %v3103_v35, %v3080_v34 }
 0x279   : > { %v3128_v48 = vadd.f32 %v3127_v27, %v3104_v39 }
 0x27b   : > { %v3150_v43 = vadd.f32 %v3149_v44, %v3128_v48 }
 0x27d   : > { %v3153_v21 = vadd.f32 %v3150_v43, %v2832_v50 }
 0x27f   : > { %v3161_v51 = vadd.f32 %v3158_v42, %v3153_v21 }
 0x281   : > { %v3164_v54 = vrot.slane %v3161_v51, 4 }
 0x283   : > { %v3165_v55 = vsel %vm322_vm3, %v3160_v53, %v3164_v54 }
 0x284   : > { %3167 = vst [vmem:[%s251_s26] sm:$0x77] %v3165_v55 }
 0x285 PF: > { %s16_s21 = sadd.s32 1, %s3271_s21  }
 0x286   : > { %p13_p4 = scmp.ge.s32.totalorder %s16_s21, 4  }
 0x288   :  { %15 = sbr.rel (!%p13_p4) target bundleno = 1 (0x1), region = 82 }

</bundles_post_ra>
